<compile_context>
chip_gen: v7x
topology: tpu7x:2x2x1
jax: 0.10.0
libtpu: 0.0.40
codegen_flags: <defaults>
</compile_context>

<pallas_src>
import functools
import numpy as np

import jax
import jax.numpy as jnp
from jax import lax
from jax.experimental import pallas as pl
from jax.experimental.pallas import tpu as pltpu

# ------------------------------ configuration ------------------------------
VIDEO_FEAT_DIM = 32    # args.video_feat_dim  (F)
LATENT_DIM     = 16    # args.latent_dim      (L)
LINEAR_DIM     = 64    # args.linear_dim      (D)
DIM_CURR       = 3     # C
DIM_PAST       = 5     # P
BN_EPS         = 1e-5
NEG_INF        = -1e30  # additive mask value for cross-batch attention scores

F, L, D, C, P = VIDEO_FEAT_DIM, LATENT_DIM, LINEAR_DIM, DIM_CURR, DIM_PAST
CF, PF = C * F, P * F
OUT  = 2 * D           # merged [future | task] head width  (=128, lane dense)
PROJ = 3 * L           # merged [theta | phi | g] projection width (=48)


def _round8(n):
  return -(-n // 8) * 8


def _slab_offsets(batch):
  """Row offsets of the packed weight slab; multi-row blocks are 8-aligned."""
  cb_pad = _round8(C * batch)
  off = {}
  off["wproj"] = 0                       # (F, PROJ)    theta|phi|g 1x1 convs
  off["wwpad"] = off["wproj"] + F        # (PROJ, F)    W conv (BN folded), zero
                                         #              except the g-lane rows
  off["w1x"]   = off["wwpad"] + PROJ     # (PF+CF, OUT) FC1 fed by x_past/x_curr
  off["w1nle"] = off["w1x"] + PF + CF    # (CF, OUT)    FC1 fed by nle
  off["w2"]    = off["w1nle"] + CF       # (OUT, OUT)   block-diagonal FC2
  off["mask"]  = off["w2"] + OUT         # (cb_pad, PB) additive batch-block mask
  off["bproj"] = off["mask"] + cb_pad    # single bias rows below
  off["bw"]    = off["bproj"] + 1
  off["b1"]    = off["bw"] + 1
  off["b2"]    = off["b1"] + 1
  off["rows"]  = off["b2"] + 1
  return off


# ------------------------------ fused kernel -------------------------------
def _fused_forward_kernel(stack_ref, xall_ref, w_ref, o_ref, *, batch):
  """Whole Network_sunNON forward in a single kernel invocation (no grid)."""
  f32 = jnp.float32
  B = batch
  CB, PB = C * B, P * B
  CPAD = _round8(CB)
  off = _slab_offsets(B)

  stack = stack_ref[...]     # (CPAD+PB, F): curr rows (c-major) | pad | past rows (p-major)
  xall  = xall_ref[...]      # (B, PF+CF):   [x_past | x_curr] flattened per batch

  # ---- fused theta/phi/g 1x1-conv projection: one MXU pass over all rows ---
  w_proj = w_ref[off["wproj"]:off["wproj"] + F, 0:PROJ]            # (F, 3L)
  b_proj = w_ref[off["bproj"]:off["bproj"] + 1, 0:PROJ]            # (1, 3L)
  proj = jnp.dot(stack, w_proj, preferred_element_type=f32) + b_proj

  theta     = proj[0:CB, 0:L]             # (CB, L)  theta of curr rows
  proj_past = proj[CPAD:CPAD + PB, :]     # (PB, 3L) 8-aligned row start
  phi       = proj_past[:, L:2 * L]       # (PB, L)

  # ---- batched block-diagonal attention (softmax over same-batch past rows)
  f = lax.dot_general(theta, phi, (((1,), (1,)), ((), ())),
                      preferred_element_type=f32)                  # (CB, PB)
  f = f + w_ref[off["mask"]:off["mask"] + CB, 0:PB]                # cross-batch -> -1e30
  f = f - jnp.max(f, axis=-1, keepdims=True)
  p = jnp.exp(f)
  p = p * pl.reciprocal(jnp.sum(p, axis=-1, keepdims=True), approx=False)

  # g stays in lanes [2L:3L) of proj_past; the packed W-conv weight is zero
  # everywhere except those rows, so (p @ proj_past) @ W_pad == (p @ g) @ W.
  y_full = jnp.dot(p, proj_past, preferred_element_type=f32)       # (CB, 3L)
  w_w = w_ref[off["wwpad"]:off["wwpad"] + PROJ, 0:F]               # (3L, F), BN folded
  b_w = w_ref[off["bw"]:off["bw"] + 1, 0:F]                        # (1, F)
  wy  = jnp.dot(y_full, w_w, preferred_element_type=f32) + b_w
  nle = jnp.maximum(wy + stack[0:CB, :], 0.0)                      # residual + ReLU

  # ---- merged FC heads (lanes [0:D)=future, [D:2D)=task), lane dense -------
  hidden = (jnp.dot(xall, w_ref[off["w1x"]:off["w1x"] + PF + CF, :],
                    preferred_element_type=f32)
            + w_ref[off["b1"]:off["b1"] + 1, :])                   # (B, 2D)
  for c in range(C):  # flatten of nle realized as C small matmuls (rows c-major)
    hidden = hidden + jnp.dot(
        nle[c * B:(c + 1) * B, :],
        w_ref[off["w1nle"] + c * F: off["w1nle"] + (c + 1) * F, :],
        preferred_element_type=f32)
  hidden = jnp.maximum(hidden, 0.0)        # ReLU; Dropout = identity (eval mode)

  out = (jnp.dot(hidden, w_ref[off["w2"]:off["w2"] + OUT, :],
                 preferred_element_type=f32)
         + w_ref[off["b2"]:off["b2"] + 1, :])                      # (B, 2D)
  o_ref[...] = out                         # single full-width lane-dense store


# ----------------------------- Pallas wrapper ------------------------------
@jax.jit
def network_sunnon_forward(wslab, x_past, x_curr):
  B = x_past.shape[0]
  CB, PB = C * B, P * B
  CPAD = _round8(CB)

  # Free XLA-side re-labelings: c-major / p-major row stacks + per-batch flatten.
  curr_rows = jnp.transpose(x_curr, (1, 0, 2)).reshape(CB, F)   # row = c*B + b
  past_rows = jnp.transpose(x_past, (1, 0, 2)).reshape(PB, F)   # row = p*B + b
  stack = jnp.concatenate(
      [curr_rows, jnp.zeros((CPAD - CB, F), jnp.float32), past_rows], axis=0)
  xall = jnp.concatenate(
      [x_past.reshape(B, PF), x_curr.reshape(B, CF)], axis=1)

  out = pl.pallas_call(
      functools.partial(_fused_forward_kernel, batch=B),
      out_shape=jax.ShapeDtypeStruct((B, OUT), jnp.float32),
      in_specs=[pl.BlockSpec(memory_space=pltpu.MemorySpace.VMEM)] * 3,
      out_specs=pl.BlockSpec(memory_space=pltpu.MemorySpace.VMEM),
  )(stack, xall, wslab)

  return out[:, :D], out[:, D:]


# ------------------------------- parameters --------------------------------
def _linear_init(kw, kb, fan_in, fan_out):
  bound = 1.0 / np.sqrt(fan_in)
  w = jax.random.uniform(kw, (fan_in, fan_out), jnp.float32, -bound, bound)
  b = jax.random.uniform(kb, (fan_out,), jnp.float32, -bound, bound)
  return w, b


def init_params(key):
  ks = jax.random.split(key, 20)
  wt, bt   = _linear_init(ks[0], ks[1], F, L)      # theta 1x1 conv
  wph, bph = _linear_init(ks[2], ks[3], F, L)      # phi
  wg, bg   = _linear_init(ks[4], ks[5], F, L)      # g
  ww, bw   = _linear_init(ks[6], ks[7], L, F)      # W conv back to F

  # BatchNorm1d(F) with non-trivial (eval-mode) statistics.
  bn_gamma = 1.0 + 0.1 * jax.random.normal(ks[8], (F,), jnp.float32)
  bn_beta  = 0.1 * jax.random.normal(ks[9], (F,), jnp.float32)
  bn_mean  = 0.1 * jax.random.normal(ks[10], (F,), jnp.float32)
  bn_var   = jax.random.uniform(ks[11], (F,), jnp.float32, 0.5, 1.5)

  f1w, f1b = _linear_init(ks[12], ks[13], 2 * CF, D)
  f2w, f2b = _linear_init(ks[14], ks[15], D, D)
  t1w, t1b = _linear_init(ks[16], ks[17], PF + 2 * CF, D)
  t2w, t2b = _linear_init(ks[18], ks[19], D, D)

  return dict(
      nlb=dict(w_theta=wt, b_theta=bt, w_phi=wph, b_phi=bph, w_g=wg, b_g=bg,
               w_w=ww, b_w=bw, bn_gamma=bn_gamma, bn_beta=bn_beta,
               bn_mean=bn_mean, bn_var=bn_var),
      fc_future=dict(w1=f1w, b1=f1b, w2=f2w, b2=f2b),
      fc_task=dict(w1=t1w, b1=t1b, w2=t2w, b2=t2b))


def pack_params(params, batch):
  """One-time eval-mode packing into a single lane-dense (rows, 128) slab."""
  nlb, pf, pt = params["nlb"], params["fc_future"], params["fc_task"]
  off = _slab_offsets(batch)
  f32 = jnp.float32

  # Fold eval-mode BatchNorm (gamma/beta/running stats) into the W projection.
  scale = nlb["bn_gamma"] / jnp.sqrt(nlb["bn_var"] + BN_EPS)
  shift = nlb["bn_beta"] - nlb["bn_mean"] * scale
  ww_f = nlb["w_w"] * scale[None, :]                     # (L, F)
  bw_f = nlb["b_w"] * scale + shift                      # (F,)

  w_proj = jnp.concatenate([nlb["w_theta"], nlb["w_phi"], nlb["w_g"]], axis=1)
  b_proj = jnp.concatenate([nlb["b_theta"], nlb["b_phi"], nlb["b_g"]])

  # W conv padded so only the g lanes of (p @ proj_past) are read.
  ww_pad = jnp.zeros((PROJ, F), f32).at[2 * L:, :].set(ww_f)

  # Merged FC1 for the x_past/x_curr part; output lanes [0:D)=future, [D:2D)=task.
  w1x = jnp.zeros((PF + CF, OUT), f32)
  w1x = w1x.at[:PF, D:].set(pt["w1"][:PF])                       # x_past -> task
  w1x = w1x.at[PF:, :D].set(pf["w1"][CF:2 * CF])                 # x_curr -> future
  w1x = w1x.at[PF:, D:].set(pt["w1"][PF + CF:PF + 2 * CF])       # x_curr -> task

  w1nle = jnp.concatenate([pf["w1"][:CF], pt["w1"][PF:PF + CF]], axis=1)
  b1 = jnp.concatenate([pf["b1"], pt["b1"]])

  w2 = jnp.zeros((OUT, OUT), f32)
  w2 = w2.at[:D, :D].set(pf["w2"])
  w2 = w2.at[D:, D:].set(pt["w2"])
  b2 = jnp.concatenate([pf["b2"], pt["b2"]])

  # Additive block-diagonal batch mask: 0 same batch, NEG_INF cross batch.
  CB, PB = C * batch, P * batch
  cb_pad = _round8(CB)
  ci = np.arange(CB)[:, None] % batch
  pi = np.arange(PB)[None, :] % batch
  mask = np.where(ci == pi, 0.0, NEG_INF).astype(np.float32)
  mask = np.pad(mask, ((0, cb_pad - CB), (0, 0)))

  def lane_pad(a):
    a = jnp.asarray(a, f32)
    if a.ndim == 1:
      a = a.reshape(1, -1)
    return jnp.pad(a, ((0, 0), (0, OUT - a.shape[1])))

  slab = jnp.concatenate([
      lane_pad(w_proj),        # rows [wproj, wproj+F)
      lane_pad(ww_pad),        # rows [wwpad, wwpad+PROJ)
      w1x,                     # rows [w1x, w1x+PF+CF)
      w1nle,                   # rows [w1nle, w1nle+CF)
      w2,                      # rows [w2, w2+OUT)
      lane_pad(mask),          # rows [mask, mask+cb_pad)
      lane_pad(b_proj),        # row bproj
      lane_pad(bw_f),          # row bw
      lane_pad(b1),            # row b1
      lane_pad(b2),            # row b2
  ], axis=0)
  assert slab.shape == (off["rows"], OUT)
  return slab


# --------------------------- pure-JAX reference ----------------------------
def reference_forward(params, x_past, x_curr):
  nlb = params["nlb"]
  theta = x_curr @ nlb["w_theta"] + nlb["b_theta"]
  phi   = x_past @ nlb["w_phi"] + nlb["b_phi"]
  g     = x_past @ nlb["w_g"] + nlb["b_g"]
  f = jnp.einsum("bcl,bpl->bcp", theta, phi)
  p = jax.nn.softmax(f, axis=-1)
  y = jnp.einsum("bcp,bpl->bcl", p, g)
  wy = y @ nlb["w_w"] + nlb["b_w"]
  wy = ((wy - nlb["bn_mean"]) / jnp.sqrt(nlb["bn_var"] + BN_EPS)
        * nlb["bn_gamma"] + nlb["bn_beta"])
  nle = jnp.maximum(wy + x_curr, 0.0)

  B = x_past.shape[0]
  all_f = jnp.concatenate([nle, x_curr], axis=1).reshape(B, -1)
  all_t = jnp.concatenate([x_past, jnp.concatenate([nle, x_curr], axis=1)],
                          axis=1).reshape(B, -1)
  pf, pt = params["fc_future"], params["fc_task"]
  of = jnp.maximum(all_f @ pf["w1"] + pf["b1"], 0.0) @ pf["w2"] + pf["b2"]
  ot = jnp.maximum(all_t @ pt["w1"] + pt["b1"], 0.0) @ pt["w2"] + pt["b2"]
  return of, ot


# ---------------------------------- main ------------------------------------
if __name__ == "__main__":
  B = 2
  key = jax.random.PRNGKey(0)
  k_p, k_c, k_w = jax.random.split(key, 3)

  x_past = jax.random.normal(k_p, (B, DIM_PAST, VIDEO_FEAT_DIM), jnp.float32)
  x_curr = jax.random.normal(k_c, (B, DIM_CURR, VIDEO_FEAT_DIM), jnp.float32)
  params = init_params(k_w)
  wslab = pack_params(params, batch=B)      # one-time eval-mode weight packing

  out_future, out_task = network_sunnon_forward(wslab, x_past, x_curr)
  jax.block_until_ready((out_future, out_task))

  ref_future, ref_task = reference_forward(params, x_past, x_curr)
  np.testing.assert_allclose(np.asarray(out_future), np.asarray(ref_future),
                             rtol=1e-5, atol=1e-5)
  np.testing.assert_allclose(np.asarray(out_task), np.asarray(ref_task),
                             rtol=1e-5, atol=1e-5)

  assert out_future.shape == (B, LINEAR_DIM)
  assert out_task.shape == (B, LINEAR_DIM)
  print("KERNEL_OK")
</pallas_src>

<mosaic_0001>
module attributes {stable_mosaic.version = 11 : i64} {
  func.func @_fused_forward_kernel(%arg0: memref<18x32xf32, #tpu.memory_space<vmem>>, %arg1: memref<2x256xf32, #tpu.memory_space<vmem>>, %arg2: memref<572x128xf32, #tpu.memory_space<vmem>>, %arg3: memref<2x128xf32, #tpu.memory_space<vmem>>) attributes {dimension_semantics = [], scalar_prefetch = 0 : i64, scratch_operands = 0 : i64, tpu.core_type = #tpu.core_type<tc>} {
    %c0 = arith.constant 0 : index
    %c0_0 = arith.constant 0 : index
    %0 = vector.load %arg0[%c0, %c0_0] : memref<18x32xf32, #tpu.memory_space<vmem>>, vector<18x32xf32>
    %c0_1 = arith.constant 0 : index
    %c0_2 = arith.constant 0 : index
    %1 = vector.load %arg1[%c0_1, %c0_2] : memref<2x256xf32, #tpu.memory_space<vmem>>, vector<2x256xf32>
    %c0_3 = arith.constant 0 : index
    %c0_4 = arith.constant 0 : index
    %2 = vector.load %arg2[%c0_3, %c0_4] : memref<572x128xf32, #tpu.memory_space<vmem>>, vector<32x48xf32>
    %c568 = arith.constant 568 : index
    %c0_5 = arith.constant 0 : index
    %3 = vector.load %arg2[%c568, %c0_5] : memref<572x128xf32, #tpu.memory_space<vmem>>, vector<1x48xf32>
    %cst = arith.constant dense<0.000000e+00> : vector<18x48xf32>
    %4 = tpu.matmul %0, %2, %cst {dimension_numbers = #tpu.dot_dimension_numbers<[1], [0], [0], [1], [0, 0, 1, 1], [], []>} : vector<18x32xf32>, vector<32x48xf32>, vector<18x48xf32> -> vector<18x48xf32>
    %5 = vector.broadcast %3 : vector<1x48xf32> to vector<18x48xf32>
    %6 = arith.addf %4, %5 : vector<18x48xf32>
    %7 = vector.extract_strided_slice %6 {offsets = [0, 0], sizes = [6, 16], strides = [1, 1]} : vector<18x48xf32> to vector<6x16xf32>
    %8 = vector.extract_strided_slice %6 {offsets = [8, 0], sizes = [10, 48], strides = [1, 1]} : vector<18x48xf32> to vector<10x48xf32>
    %9 = vector.extract_strided_slice %8 {offsets = [0, 16], sizes = [10, 16], strides = [1, 1]} : vector<10x48xf32> to vector<10x16xf32>
    %cst_6 = arith.constant dense<0.000000e+00> : vector<6x10xf32>
    %10 = tpu.matmul %7, %9, %cst_6 {dimension_numbers = #tpu.dot_dimension_numbers<[1], [1], [0], [0], [0, 0, 1, 0], [], []>} : vector<6x16xf32>, vector<10x16xf32>, vector<6x10xf32> -> vector<6x10xf32>
    %c560 = arith.constant 560 : index
    %c0_7 = arith.constant 0 : index
    %11 = vector.load %arg2[%c560, %c0_7] : memref<572x128xf32, #tpu.memory_space<vmem>>, vector<6x10xf32>
    %12 = arith.addf %10, %11 : vector<6x10xf32>
    %cst_8 = arith.constant dense<0xFF800000> : vector<6xf32>
    %13 = vector.multi_reduction <maximumf>, %12, %cst_8 [1] : vector<6x10xf32> to vector<6xf32>
    %14 = vector.shape_cast %13 : vector<6xf32> to vector<6x1xf32>
    %15 = vector.broadcast %14 : vector<6x1xf32> to vector<6x10xf32>
    %16 = arith.subf %12, %15 : vector<6x10xf32>
    %17 = math.exp %16 : vector<6x10xf32>
    %cst_9 = arith.constant dense<0.000000e+00> : vector<6xf32>
    %18 = vector.multi_reduction <add>, %17, %cst_9 [1] : vector<6x10xf32> to vector<6xf32>
    %19 = vector.shape_cast %18 : vector<6xf32> to vector<6x1xf32>
    %20 = tpu.reciprocal %19 : vector<6x1xf32> -> vector<6x1xf32>
    %21 = vector.broadcast %20 : vector<6x1xf32> to vector<6x10xf32>
    %22 = arith.mulf %17, %21 : vector<6x10xf32>
    %cst_10 = arith.constant dense<0.000000e+00> : vector<6x48xf32>
    %23 = tpu.matmul %22, %8, %cst_10 {dimension_numbers = #tpu.dot_dimension_numbers<[1], [0], [0], [1], [0, 0, 1, 1], [], []>} : vector<6x10xf32>, vector<10x48xf32>, vector<6x48xf32> -> vector<6x48xf32>
    %c32 = arith.constant 32 : index
    %c0_11 = arith.constant 0 : index
    %24 = vector.load %arg2[%c32, %c0_11] : memref<572x128xf32, #tpu.memory_space<vmem>>, vector<48x32xf32>
    %c569 = arith.constant 569 : index
    %c0_12 = arith.constant 0 : index
    %25 = vector.load %arg2[%c569, %c0_12] : memref<572x128xf32, #tpu.memory_space<vmem>>, vector<1x32xf32>
    %cst_13 = arith.constant dense<0.000000e+00> : vector<6x32xf32>
    %26 = tpu.matmul %23, %24, %cst_13 {dimension_numbers = #tpu.dot_dimension_numbers<[1], [0], [0], [1], [0, 0, 1, 1], [], []>} : vector<6x48xf32>, vector<48x32xf32>, vector<6x32xf32> -> vector<6x32xf32>
    %27 = vector.broadcast %25 : vector<1x32xf32> to vector<6x32xf32>
    %28 = arith.addf %26, %27 : vector<6x32xf32>
    %29 = vector.extract_strided_slice %0 {offsets = [0, 0], sizes = [6, 32], strides = [1, 1]} : vector<18x32xf32> to vector<6x32xf32>
    %30 = arith.addf %28, %29 : vector<6x32xf32>
    %cst_14 = arith.constant 0.000000e+00 : f32
    %31 = vector.broadcast %cst_14 : f32 to vector<6x32xf32>
    %32 = arith.maximumf %30, %31 : vector<6x32xf32>
    %c80 = arith.constant 80 : index
    %c0_15 = arith.constant 0 : index
    %33 = vector.load %arg2[%c80, %c0_15] : memref<572x128xf32, #tpu.memory_space<vmem>>, vector<256x128xf32>
    %cst_16 = arith.constant dense<0.000000e+00> : vector<2x128xf32>
    %34 = tpu.matmul %1, %33, %cst_16 {dimension_numbers = #tpu.dot_dimension_numbers<[1], [0], [0], [1], [0, 0, 1, 1], [], []>} : vector<2x256xf32>, vector<256x128xf32>, vector<2x128xf32> -> vector<2x128xf32>
    %c570 = arith.constant 570 : index
    %c0_17 = arith.constant 0 : index
    %35 = vector.load %arg2[%c570, %c0_17] : memref<572x128xf32, #tpu.memory_space<vmem>>, vector<1x128xf32>
    %36 = vector.broadcast %35 : vector<1x128xf32> to vector<2x128xf32>
    %37 = arith.addf %34, %36 : vector<2x128xf32>
    %38 = vector.extract_strided_slice %32 {offsets = [0, 0], sizes = [2, 32], strides = [1, 1]} : vector<6x32xf32> to vector<2x32xf32>
    %c336 = arith.constant 336 : index
    %c0_18 = arith.constant 0 : index
    %39 = vector.load %arg2[%c336, %c0_18] : memref<572x128xf32, #tpu.memory_space<vmem>>, vector<32x128xf32>
    %cst_19 = arith.constant dense<0.000000e+00> : vector<2x128xf32>
    %40 = tpu.matmul %38, %39, %cst_19 {dimension_numbers = #tpu.dot_dimension_numbers<[1], [0], [0], [1], [0, 0, 1, 1], [], []>} : vector<2x32xf32>, vector<32x128xf32>, vector<2x128xf32> -> vector<2x128xf32>
    %41 = arith.addf %37, %40 : vector<2x128xf32>
    %42 = vector.extract_strided_slice %32 {offsets = [2, 0], sizes = [2, 32], strides = [1, 1]} : vector<6x32xf32> to vector<2x32xf32>
    %c368 = arith.constant 368 : index
    %c0_20 = arith.constant 0 : index
    %43 = vector.load %arg2[%c368, %c0_20] : memref<572x128xf32, #tpu.memory_space<vmem>>, vector<32x128xf32>
    %cst_21 = arith.constant dense<0.000000e+00> : vector<2x128xf32>
    %44 = tpu.matmul %42, %43, %cst_21 {dimension_numbers = #tpu.dot_dimension_numbers<[1], [0], [0], [1], [0, 0, 1, 1], [], []>} : vector<2x32xf32>, vector<32x128xf32>, vector<2x128xf32> -> vector<2x128xf32>
    %45 = arith.addf %41, %44 : vector<2x128xf32>
    %46 = vector.extract_strided_slice %32 {offsets = [4, 0], sizes = [2, 32], strides = [1, 1]} : vector<6x32xf32> to vector<2x32xf32>
    %c400 = arith.constant 400 : index
    %c0_22 = arith.constant 0 : index
    %47 = vector.load %arg2[%c400, %c0_22] : memref<572x128xf32, #tpu.memory_space<vmem>>, vector<32x128xf32>
    %cst_23 = arith.constant dense<0.000000e+00> : vector<2x128xf32>
    %48 = tpu.matmul %46, %47, %cst_23 {dimension_numbers = #tpu.dot_dimension_numbers<[1], [0], [0], [1], [0, 0, 1, 1], [], []>} : vector<2x32xf32>, vector<32x128xf32>, vector<2x128xf32> -> vector<2x128xf32>
    %49 = arith.addf %45, %48 : vector<2x128xf32>
    %cst_24 = arith.constant 0.000000e+00 : f32
    %50 = vector.broadcast %cst_24 : f32 to vector<2x128xf32>
    %51 = arith.maximumf %49, %50 : vector<2x128xf32>
    %c432 = arith.constant 432 : index
    %c0_25 = arith.constant 0 : index
    %52 = vector.load %arg2[%c432, %c0_25] : memref<572x128xf32, #tpu.memory_space<vmem>>, vector<128x128xf32>
    %cst_26 = arith.constant dense<0.000000e+00> : vector<2x128xf32>
    %53 = tpu.matmul %51, %52, %cst_26 {dimension_numbers = #tpu.dot_dimension_numbers<[1], [0], [0], [1], [0, 0, 1, 1], [], []>} : vector<2x128xf32>, vector<128x128xf32>, vector<2x128xf32> -> vector<2x128xf32>
    %c571 = arith.constant 571 : index
    %c0_27 = arith.constant 0 : index
    %54 = vector.load %arg2[%c571, %c0_27] : memref<572x128xf32, #tpu.memory_space<vmem>>, vector<1x128xf32>
    %55 = vector.broadcast %54 : vector<1x128xf32> to vector<2x128xf32>
    %56 = arith.addf %53, %55 : vector<2x128xf32>
    %c0_28 = arith.constant 0 : index
    %c0_29 = arith.constant 0 : index
    %57 = vector.load %arg3[%c0_28, %c0_29] : memref<2x128xf32, #tpu.memory_space<vmem>>, vector<2x128xf32>
    tpu.vector_store %arg3[%c0_28, %c0_29], %56 {strides = array<i32>} : memref<2x128xf32, #tpu.memory_space<vmem>>, vector<2x128xf32>,
    return
  }
}

</mosaic_0001>

<bundles_post_ra>
// kernel: network_sunnon_forward.1
= control target key start
LH: loop header
LB: loop body
LE: loop exit
PB: predicated region body
PF: predicated region fallthrough
CT: control target
= control target key end

     0   :  { %8 = vsyncpa [#allocation3], 0  ;;  %s1202_s12 = smov [#allocation2]   ;;  %s1311_s0 = inlined_call_operand.vmem [shape: f32[18,32], index: 0, kind: input, shape index: {}]   ;;  %s1312_s1 = inlined_call_operand.vmem [shape: f32[2,256], index: 1, kind: input, shape index: {}]   ;;  %s1313_s2 = inlined_call_operand.hbm [shape: f32[572,128], index: 2, kind: input, shape index: {}]   ;;  %s1314_s3 = inlined_call_operand.vmem [shape: f32[2,128], index: 3, kind: output, shape index: {}]  }
   0x1   :  { %s18_s13 = sshll.u32 %s1202_s12, 4  ;;  %s1178_s16 = scalar_lea.hbm %s1313_s2, 9216  ;;  %s19_s13 = int_to_ptr.vmem [resolvable:$true] %s18_s13 }
   0x2   :  { %p1179_p0 = scmp.ne.s32.totalorder %s1313_s2, %s1178_s16  ;;  %p1182_p1 = scmp.lt.u32.totalorder %s1178_s16, %s1313_s2 }
   0x4   :  { %p1184_p2 = pnand %p1182_p1, %p1179_p0 }
   0x6   :  { %1187 = shalt.err (!%p1184_p2)
}
   0x7   :  { %s1188_s21 = scalar_lea.vmem %s19_s13, 9216  ;;  %p1193_p4 = scmp.lt.s32.totalorder %s19_s13, %s19_s13 }
   0x8   :  { %p1189_p3 = scmp.ne.s32.totalorder %s19_s13, %s1188_s21  ;;  %p1194_p5 = scmp.lt.s32.totalorder %s1188_s21, %s1188_s21 }
   0xa   :  { %p1195_p6 = por %p1194_p5, %p1193_p4 }
   0xc   :  { %p1196_p7 = pnand %p1195_p6, %p1189_p3 }
   0xe   :  { %1199 = shalt.err (!%p1196_p7)
}
   0xf   :  { %s1203_s22 = smov 128   ;;  %s1204_s23 = smov 8  }
  0x10   :  { %24 = dma.hbm_to_vmem [thread:$0]  %s1313_s2, 9216, %s19_s13, [#allocation3], %s1203_s22, %s1203_s22, %s1204_s23  }
  0x11   :  { %1200 = dma.done.wait [#allocation3], 9216  }
  0x12   :  { %1201 = vsyncadd [#allocation3], 4294958080  ;;  %v1205_v0 = vmov 0.0|0.0   ;;  %vm1206_vm0 = vmmov 0   ;;  %v1207_v1 = vmov 0.0   ;;  %v32_v2 = vld [vmem:[#allocation2] sm:$0xff] }
  0x13   :  { %1060 = vmatprep.subr.bf16.mxu1 %v1205_v0  ;;  %954 = vmatprep.mubr.msk.f32.mxu1 %vm1206_vm0, %v1207_v1  ;;  %v33_v3 = vld [vmem:[#allocation2 + $0x8] sm:$0xff]  ;;  %v34_v4 = vld [vmem:[#allocation2 + $0x10] sm:$0xff]  ;;  %v35_v6 = vld [vmem:[#allocation2 + $0x18] sm:$0xff]  ;;  %vm41_vm1 = vcmask 261120   ;;  %s1208_s4 = smov 112   ;;  %vm138_vm2 = vcmask 130048  }
  0x14   :  { %1074 = vmatprep.subr.bf16.mxu0 %v1205_v0  ;;  %989 = vmatprep.mubr.msk.f32.mxu0 %vm1206_vm0, %v1207_v1  ;;  %v1061_v5 = vpack.c.bf16 %v33_v3, %v32_v2  ;;  %v1064_v7 = vpack.c.bf16 %v35_v6, %v34_v4  ;;  %v1252_v8 = vld [vmem:[%s1311_s0] sm:$0xff]  ;;  %v29_v9 = vld [vmem:[%s1311_s0 + $0x8] sm:$0xff]  ;;  %v30_v10 = vld [vmem:[%s1311_s0 + $0x10] sm:$0x3]  ;;  %vm232_vm4 = vcmask 1041408   ;;  %vm1209_vm5 = vmmov 1  }
  0x15   :  { %v842_v11 = vld [vmem:[#allocation2 + $0x238] ss:$0 sm:$0xff]  ;;  %vm1068_vm3 = vmpackc.low %vm138_vm2, %vm138_vm2  ;;  %v131_v27 = vld [vmem:[#allocation2 + $0x230] sm:$0x3f]  ;;  %vm216_vm7 = vcmask 78848   ;;  %vm228_vm8 = vcmask 80896  }
  0x16   :  { %1062 = vmatpush3.bf16.msra.mxu1 %v1061_v5  ;;  %vm1072_vm6 = vmpackc.low %vm232_vm4, %vm1209_vm5  ;;  %v305_v37 = vld [vmem:[#allocation2 + $0x20] sm:$0xff]  ;;  %v306_v38 = vld [vmem:[#allocation2 + $0x28] sm:$0xff]  ;;  %vm316_vm9 = vcmask 392192  }
  0x17   :  { %1063 = vmatprep.subr.bf16.mxu1 %v1205_v0  ;;  %v307_v39 = vld [vmem:[#allocation2 + $0x30] sm:$0xff]  ;;  %v1075_v40 = vpack.c.bf16 %v306_v38, %v305_v37  ;;  %v308_v41 = vld [vmem:[#allocation2 + $0x38] sm:$0xff]  ;;  %v309_v43 = vld [vmem:[#allocation2 + $0x40] sm:$0xff] }
  0x18   :  { %v1078_v42 = vpack.c.bf16 %v308_v41, %v307_v39  ;;  %v310_v44 = vld [vmem:[#allocation2 + $0x48] sm:$0xff]  ;;  %v408_v49 = vld [vmem:[#allocation2 + $0xd0] sm:$0xff]  ;;  %v409_v50 = vld [vmem:[#allocation2 + $0xd8] sm:$0xff] }
  0x19   :  { %1076 = vmatpush3.bf16.msra.mxu0 %v1075_v40  ;;  %v1081_v45 = vpack.c.bf16 %v310_v44, %v309_v43  ;;  %v392_v51 = vld [vmem:[#allocation2 + $0x50] sm:$0xff]  ;;  %v1083_v52 = vpack.c.bf16 %v409_v50, %v408_v49  ;;  %v393_v53 = vld [vmem:[#allocation2 + $0x58] sm:$0xff]  ;;  %v410_v54 = vld [vmem:[#allocation2 + $0xe0] sm:$0xff] }
  0x1a   :  { %1065 = vmatpush3.bf16.msra.mxu1 %v1064_v7  ;;  %1077 = vmatprep.subr.bf16.mxu0 %v1205_v0  ;;  %v411_v55 = vld [vmem:[#allocation2 + $0xe8] sm:$0xff]  ;;  %v1085_v56 = vpack.c.bf16 %v393_v53, %v392_v51  ;;  %v394_v58 = vld [vmem:[#allocation2 + $0x60] sm:$0xff]  ;;  %v412_v60 = vld [vmem:[#allocation2 + $0xf0] sm:$0xff] }
  0x1b   :  { %1066 = vmatprep.subr.bf16.mxu1 %v1205_v0  ;;  %v1087_v57 = vpack.c.bf16 %v411_v55, %v410_v54  ;;  %v395_v59 = vld [vmem:[#allocation2 + $0x68] sm:$0xff]  ;;  %v413_v61 = vld [vmem:[#allocation2 + $0xf8] sm:$0xff]  ;;  %v396_v2 = vld [vmem:[#allocation2 + $0x70] sm:$0xff] }
  0x1c   :  { %v1089_v62 = vpack.c.bf16 %v395_v59, %v394_v58  ;;  %v1091_v63 = vpack.c.bf16 %v413_v61, %v412_v60  ;;  %v397_v3 = vld [vmem:[#allocation2 + $0x78] sm:$0xff]  ;;  %v414_v4 = vld [vmem:[#allocation2 + $0x100] sm:$0xff]  ;;  %v415_v5 = vld [vmem:[#allocation2 + $0x108] sm:$0xff] }
  0x1d   :  { %955 = vmatmul.mubr.msk.f32.vlgmr.msra.gmra.mrb[0].mxu1 %vm41_vm1, %v1252_v8  ;;  %1079 = vmatpush3.bf16.msra.mxu0 %v1078_v42  ;;  %v1093_v6 = vpack.c.bf16 %v397_v3, %v396_v2  ;;  %v1095_v7 = vpack.c.bf16 %v415_v5, %v414_v4  ;;  %v510_v40 = vld [vmem:[#allocation2 + $0x150] sm:$0xff]  ;;  %v511_v41 = vld [vmem:[#allocation2 + $0x158] sm:$0xff]  ;;  %v590_v49 = vld [vmem:[#allocation2 + $0x180] sm:$0xff] }
  0x1e   :  { %957 = vmatprep.mubr.msk.f32.mxu1 %vm1206_vm0, %v1207_v1  ;;  %1080 = vmatprep.subr.bf16.mxu0 %v1205_v0  ;;  %v1116_v42 = vpack.c.bf16 %v511_v41, %v510_v40  ;;  %v588_v43 = vld [vmem:[#allocation2 + $0x170] sm:$0xff]  ;;  %v589_v44 = vld [vmem:[#allocation2 + $0x178] sm:$0xff]  ;;  %v591_v50 = vld [vmem:[#allocation2 + $0x188] sm:$0xff] }
  0x1f   :  { %v1125_v51 = vpack.c.bf16 %v591_v50, %v590_v49  ;;  %v851_v55 = vld [vmem:[#allocation2 + $0x239] ss:$0 sm:$0xff]  ;;  %v666_v60 = vld [vmem:[#allocation2 + $0x190] sm:$0xff]  ;;  %v668_v3 = vld [vmem:[#allocation2 + $0x1a0] sm:$0xff] }
  0x20   :  { %v667_v61 = vld [vmem:[#allocation2 + $0x198] sm:$0xff]  ;;  %v669_v4 = vld [vmem:[#allocation2 + $0x1a8] sm:$0xff] }
  0x21   :  { %958 = vmatmul.mubr.msk.f32.gmra.mrb[2].mxu1 %vm41_vm1, %v29_v9  ;;  %1082 = vmatpush3.bf16.msra.mxu0 %v1081_v45  ;;  %v398_v9 = vld [vmem:[#allocation2 + $0x80] sm:$0xff]  ;;  %v1122_v45 = vpack.c.bf16 %v589_v44, %v588_v43  ;;  %v1131_v5 = vpack.c.bf16 %v669_v4, %v668_v3 }
  0x22   :  { %960 = vmatprep.mubr.msk.f32.mxu1 %vm1206_vm0, %v1207_v1  ;;  %1121 = vmatprep.subr.bf16.mxu0 %v1205_v0 }
  0x25   :  { %961 = vmatmul.mubr.msk.f32.gmra.mrb[4].mxu1 %vm41_vm1, %v30_v10  ;;  %v399_v10 = vld [vmem:[#allocation2 + $0x88] sm:$0xff] }
  0x26   :  { %967 = vmatprep.mubr.msk.f32.mxu1 %vm1206_vm0, %v1207_v1 }
  0xf0   :  { %v117_v12 = vpop.f32.mrb[0].mxu1 }
  0xf1   :  { %v118_v13 = vadd.f32 %v842_v11, %v117_v12  ;;  %v956_v14 = vpop.f32.mrb[1].mxu1  ;;  %v417_v12 = vld [vmem:[#allocation2 + $0x118] sm:$0xff] }
  0xf4   :  { %v122_v15 = vpop.f32.mrb[2].mxu1 }
  0xf5   :  { %v959_v16 = vpop.f32.mrb[3].mxu1  ;;  %v123_v18 = vadd.f32 %v842_v11, %v122_v15  ;;  %v1097_v15 = vpack.c.bf16 %v399_v10, %v398_v9  ;;  %v747_v10 = vld [vmem:[#allocation2 + $0x1c0] sm:$0xff] }
  0xf8   :  { %v127_v17 = vpop.f32.mrb[4].mxu1 }
  0xf9   :  { %v128_v19 = vadd.f32 %v842_v11, %v127_v17  ;;  %v962_v20 = vpop.f32.mrb[5].mxu1  ;;  %v416_v11 = vld [vmem:[#allocation2 + $0x110] sm:$0xff] }
  0xfa   :  { %v1099_v16 = vpack.c.bf16 %v417_v12, %v416_v11  ;;  %v400_v17 = vld [vmem:[#allocation2 + $0x90] sm:$0xff]  ;;  %v419_v20 = vld [vmem:[#allocation2 + $0x128] sm:$0xff] }
  0xfb   :  { %v1071_v21 = vpack.c.bf16 %v128_v19, %v123_v18  ;;  %v1169_v22 = vpack.i.bf16 %v128_v19, %v123_v18  ;;  %v401_v18 = vld [vmem:[#allocation2 + $0x98] sm:$0xff]  ;;  %v418_v19 = vld [vmem:[#allocation2 + $0x120] sm:$0xff]  ;;  %v748_v11 = vld [vmem:[#allocation2 + $0x1c8] sm:$0xff] }
  0xfc   :  { %v1137_v12 = vpack.c.bf16 %v748_v11, %v747_v10 }
  0xfd   :  { %1170 = vrot.lane.b32.xlu0 %v1169_v22, %s1208_s4  ;;  %v1103_v22 = vpack.c.bf16 %v419_v20, %v418_v19  ;;  %v753_v19 = vld [vmem:[#allocation2 + $0x1f0] sm:$0xff]  ;;  %v754_v20 = vld [vmem:[#allocation2 + $0x1f8] sm:$0xff] }
 0x16f   :  { %v1171_v23 = vpop.permute.xlu0 %1170 }
 0x170   :  { %v1173_v24 = vunpack.i.h.bf16 %v1171_v23  ;;  %v1172_v25 = vunpack.i.l.bf16 %v1171_v23  ;;  %v402_v23 = vld [vmem:[#allocation2 + $0xa0] sm:$0xff] }
 0x172   :  { %v1067_v26 = vpack.c.bf16 %v1173_v24, %v1172_v25  ;;  %v403_v24 = vld [vmem:[#allocation2 + $0xa8] sm:$0xff]  ;;  %v420_v25 = vld [vmem:[#allocation2 + $0x130] sm:$0xff] }
 0x174   :  { %1069 = vmatpush3.bf16.xpose.msk.msra.mxu1 %vm1068_vm3, %v1067_v26  ;;  %v421_v26 = vld [vmem:[#allocation2 + $0x138] sm:$0xff] }
 0x175   :  { %1070 = vmatprep.subr.bf16.mxu1 %v1205_v0 }
 0x17b   :  { %968 = vmatmul.mubr.msk.f32.vlgmr.msra.gmra.mrb[6].mxu1 %vm138_vm2, %v118_v13  ;;  %v854_v13 = vld.sshfl [vmem:[%s1312_s1] sm:$0x33 pattern:$0x76325410] }
 0x17c   :  { %1073 = vmatpush3.bf16.msk.msra.mxu1 %vm1072_vm6, %v1071_v21  ;;  %974 = vmatprep.mubr.msk.f32.mxu1 %vm1206_vm0, %v1207_v1  ;;  %v437_v14 = vcombine.high %v854_v13, %v854_v13  ;;  %v1101_v21 = vpack.c.bf16 %v401_v18, %v400_v17  ;;  %v752_v17 = vld [vmem:[#allocation2 + $0x1e8] sm:$0xff] }
 0x17d   :  { %1084 = vmatprep.subr.bf16.mxu1 %v1083_v52 }
 0x24e   :  { %v212_v28 = vpop.f32.mrb[6].mxu1 }
 0x24f   :  { %v213_v29 = vadd.f32 %v212_v28, %v131_v27  ;;  %v969_v30 = vpop.f32.mrb[7].mxu1  ;;  %v1105_v27 = vpack.c.bf16 %v403_v24, %v402_v23  ;;  %v1107_v28 = vpack.c.bf16 %v421_v26, %v420_v25  ;;  %v757_v23 = vld [vmem:[#allocation2 + $0x210] sm:$0xff]  ;;  %v758_v25 = vld [vmem:[#allocation2 + $0x218] sm:$0xff] }
 0x250   :  { %v405_v30 = vld [vmem:[#allocation2 + $0xb8] sm:$0xff]  ;;  %v1152_v26 = vpack.c.bf16 %v758_v25, %v757_v23 }
 0x251   :  { %v217_v31 = vsel %vm216_vm7, %v213_v29, -inf }
 0x252   :  { %218 = vmax.xlane.f32.xlu0 %v217_v31  ;;  %v422_v31 = vld [vmem:[#allocation2 + $0x140] sm:$0xff] }
 0x2df   :  { %v219_v32 = vpop.xlane.xlu0 %218 }
 0x2e0   :  { %v220_v33 = vsub.f32 %v213_v29, %v219_v32  ;;  %v404_v29 = vld [vmem:[#allocation2 + $0xb0] sm:$0xff]  ;;  %v423_v32 = vld [vmem:[#allocation2 + $0x148] sm:$0xff] }
 0x2e2   :  { %v221_v34 = vmul.f32 1.442695, %v220_v33  ;;  %v1109_v33 = vpack.c.bf16 %v405_v30, %v404_v29  ;;  %v853_v30 = vld [vmem:[#allocation2 + $0x23a] ss:$0 sm:$0xff] }
 0x2e4   :  { %1174 = vpow2.f32 %v221_v34  ;;  %v1111_v34 = vpack.c.bf16 %v423_v32, %v422_v31 }
 0x2ee   :  { %v1175_v35 = vpop.eup %1174 }
 0x2ef   :  { %v223_v36 = vsel %vm216_vm7, %v1175_v35, 0.0 }
 0x2f0   :  { %224 = vadd.xlane.f32.xlu1 %v223_v36  ;;  %v407_v36 = vld [vmem:[#allocation2 + $0xc8] sm:$0xff] }
 0x37d   :  { %v225_v46 = vpop.xlane.xlu1 %224 }
 0x37e   :  { %1176 = vrcp.f32 %v225_v46  ;;  %v512_v46 = vld [vmem:[#allocation2 + $0x160] sm:$0xff] }
 0x388   :  { %v1177_v47 = vpop.eup %1176 }
 0x389   :  { %v227_v48 = vmul.f32 %v1177_v47, %v1175_v35  ;;  %v406_v35 = vld [vmem:[#allocation2 + $0xc0] sm:$0xff]  ;;  %v513_v47 = vld [vmem:[#allocation2 + $0x168] sm:$0xff] }
 0x38a   :  { %v1113_v37 = vpack.c.bf16 %v407_v36, %v406_v35 }
 0x38b   :  { %975 = vmatmul.mubr.msk.f32.vlgmr.msra.gmra.mrb[8].mxu1 %vm228_vm8, %v227_v48  ;;  %v1119_v48 = vpack.c.bf16 %v513_v47, %v512_v46 }
 0x38c   :  { %1086 = vmatpush3.bf16.msra.mxu1 %v1085_v56  ;;  %504 = vmatprep.mubr.f32.mxu1 %v437_v14  ;;  %v750_v14 = vld [vmem:[#allocation2 + $0x1d8] sm:$0xff] }
 0x38d   :  { %1088 = vmatprep.subr.bf16.mxu1 %v1087_v57 }
 0x390   :  { %1090 = vmatpush3.bf16.msra.mxu1 %v1089_v62 }
 0x391   :  { %1092 = vmatprep.subr.bf16.mxu1 %v1091_v63  ;;  %v1128_v63 = vpack.c.bf16 %v667_v61, %v666_v60 }
 0x394   :  { %1094 = vmatpush3.bf16.msra.mxu1 %v1093_v6  ;;  %v745_v6 = vld [vmem:[#allocation2 + $0x1b0] sm:$0xff] }
 0x395   :  { %1096 = vmatprep.subr.bf16.mxu1 %v1095_v7 }
 0x398   :  { %1098 = vmatpush3.bf16.msra.mxu1 %v1097_v15 }
 0x399   :  { %1100 = vmatprep.subr.bf16.mxu1 %v1099_v16  ;;  %v751_v16 = vld [vmem:[#allocation2 + $0x1e0] sm:$0xff] }
 0x39a   :  { %v1143_v18 = vpack.c.bf16 %v752_v17, %v751_v16 }
 0x39c   :  { %1102 = vmatpush3.bf16.msra.mxu1 %v1101_v21  ;;  %v755_v21 = vld [vmem:[#allocation2 + $0x200] sm:$0xff] }
 0x39d   :  { %1104 = vmatprep.subr.bf16.mxu1 %v1103_v22  ;;  %v756_v22 = vld [vmem:[#allocation2 + $0x208] sm:$0xff] }
 0x39e   :  { %v1149_v24 = vpack.c.bf16 %v756_v22, %v755_v21 }
 0x3a0   :  { %1106 = vmatpush3.bf16.msra.mxu1 %v1105_v27  ;;  %v759_v27 = vld [vmem:[#allocation2 + $0x220] sm:$0xff] }
 0x3a1   :  { %1108 = vmatprep.subr.bf16.mxu1 %v1107_v28  ;;  %v760_v28 = vld [vmem:[#allocation2 + $0x228] sm:$0xff] }
 0x3a2   :  { %v1155_v29 = vpack.c.bf16 %v760_v28, %v759_v27 }
 0x3a4   :  { %1110 = vmatpush3.bf16.msra.mxu1 %v1109_v33 }
 0x3a5   :  { %1112 = vmatprep.subr.bf16.mxu1 %v1111_v34 }
 0x3a8   :  { %1114 = vmatpush3.bf16.msra.mxu1 %v1113_v37 }
 0x3a9   :  { %1115 = vmatprep.subr.bf16.mxu1 %v1205_v0 }
 0x3ab   :  { %505 = vmatmul.mubr.f32.vlgmr.msra.gmra.mrb[10].mxu1 %v854_v13  ;;  %v749_v13 = vld [vmem:[#allocation2 + $0x1d0] sm:$0xff] }
 0x3ac   :  { %1000 = vmatprep.mubr.msk.f32.mxu1 %vm1206_vm0, %v1207_v1  ;;  %1117 = vmatpush3.bf16.msra.mxu1 %v1116_v42  ;;  %v1140_v15 = vpack.c.bf16 %v750_v14, %v749_v13 }
 0x3ad   :  { %1118 = vmatprep.subr.bf16.mxu1 %v1205_v0 }
 0x3b0   :  { %1120 = vmatpush3.bf16.msra.mxu1 %v1119_v48 }
 0x45e   :  { %v301_v38 = vpop.f32.mrb[8].mxu1 }
 0x45f   :  { %v976_v39 = vpop.f32.mrb[9].mxu1  ;;  %990 = vmatmul.mubr.msk.f32.vlgmr.msra.gmra.mrb[0].mxu0 %vm316_vm9, %v301_v38 }
 0x460   :  { %1011 = vmatprep.mubr.msk.f32.mxu0 %vm1206_vm0, %v1207_v1  ;;  %1123 = vmatpush3.bf16.msra.mxu0 %v1122_v45  ;;  %v858_v39 = vld [vmem:[#allocation2 + $0x23b] ss:$0 sm:$0xff] }
 0x461   :  { %1124 = vmatprep.subr.bf16.mxu0 %v1205_v0 }
 0x464   :  { %1126 = vmatpush3.bf16.msra.mxu0 %v1125_v51 }
 0x465   :  { %1127 = vmatprep.subr.bf16.mxu0 %v1205_v0 }
 0x47e   :  { %v911_v52 = vpop.f32.mrb[10].mxu1 }
 0x47f   :  { %v912_v53 = vpop.f32.mrb[11].mxu1 }
 0x480   :  { %v1288_v54 = vadd.f32 %v912_v53, %v911_v52 }
 0x482   :  { %v507_v31 = vadd.f32 %v1288_v54, %v853_v30 }
 0x532   :  { %v386_v56 = vpop.f32.mrb[0].mxu0 }
 0x533   :  { %v387_v57 = vadd.f32 %v851_v55, %v386_v56  ;;  %v991_v58 = vpop.f32.mrb[1].mxu0 }
 0x535   :  { %v390_v59 = vadd.f32 %v387_v57, %v1252_v8  ;;  %v746_v8 = vld [vmem:[#allocation2 + $0x1b8] sm:$0xff] }
 0x536   :  { %v1134_v7 = vpack.c.bf16 %v746_v8, %v745_v6 }
 0x537   :  { %v391_v62 = vmax.f32 %v390_v59, 0.0 }
 0x539   :  { %v592_v2 = vrot.slane %v391_v62, 2  ;;  %1001 = vmatmul.mubr.msk.f32.vlgmr.msra.gmra.mrb[12].mxu1 %vm41_vm1, %v391_v62  ;;  %v670_v9 = vrot.slane %v391_v62, 4 }
 0x53b   :  { %1012 = vmatmul.mubr.msk.f32.vlgmr.msra.gmra.mrb[2].mxu0 %vm41_vm1, %v592_v2 }
 0x53c   :  { %1129 = vmatpush3.bf16.msra.mxu0 %v1128_v63  ;;  %1022 = vmatprep.mubr.msk.f32.mxu0 %vm1206_vm0, %v1207_v1 }
 0x53d   :  { %1130 = vmatprep.subr.bf16.mxu0 %v1205_v0 }
 0x540   :  { %1132 = vmatpush3.bf16.msra.mxu0 %v1131_v5 }
 0x541   :  { %1133 = vmatprep.subr.bf16.mxu0 %v1205_v0 }
 0x543   :  { %1023 = vmatmul.mubr.msk.f32.vlgmr.msra.gmra.mrb[2].mxu0 %vm41_vm1, %v670_v9 }
 0x544   :  { %1135 = vmatpush3.bf16.msra.mxu0 %v1134_v7  ;;  %1057 = vmatprep.mubr.msk.f32.mxu0 %vm1206_vm0, %v1207_v1  ;;  %v1146_v1 = vpack.c.bf16 %v754_v20, %v753_v19 }
 0x545   :  { %1136 = vmatprep.subr.bf16.mxu0 %v1205_v0 }
 0x548   :  { %1138 = vmatpush3.bf16.msra.mxu0 %v1137_v12 }
 0x549   :  { %1139 = vmatprep.subr.bf16.mxu0 %v1205_v0 }
 0x54c   :  { %1141 = vmatpush3.bf16.msra.mxu0 %v1140_v15 }
 0x54d   :  { %1142 = vmatprep.subr.bf16.mxu0 %v1205_v0 }
 0x550   :  { %1144 = vmatpush3.bf16.msra.mxu0 %v1143_v18 }
 0x551   :  { %1145 = vmatprep.subr.bf16.mxu0 %v1205_v0 }
 0x554   :  { %1147 = vmatpush3.bf16.msra.mxu0 %v1146_v1 }
 0x555   :  { %1148 = vmatprep.subr.bf16.mxu0 %v1205_v0 }
 0x558   :  { %1150 = vmatpush3.bf16.msra.mxu0 %v1149_v24 }
 0x559   :  { %1151 = vmatprep.subr.bf16.mxu0 %v1205_v0 }
 0x55c   :  { %1153 = vmatpush3.bf16.msra.mxu0 %v1152_v26 }
 0x55d   :  { %1154 = vmatprep.subr.bf16.mxu0 %v1205_v0 }
 0x560   :  { %1156 = vmatpush3.bf16.msra.mxu0 %v1155_v29 }
 0x60c   :  { %v583_v32 = vpop.f32.mrb[12].mxu1 }
 0x60d   :  { %v587_v33 = vadd.f32 %v583_v32, %v507_v31  ;;  %v1002_v34 = vpop.f32.mrb[13].mxu1 }
 0x616   :  { %v739_v35 = vpop.f32.mrb[2].mxu0 }
 0x617   :  { %v1158_v36 = vadd.f32 %v739_v35, %v587_v33  ;;  %v1024_v37 = vpop.f32.mrb[3].mxu0 }
 0x619   :  { %v744_v38 = vmax.f32 %v1158_v36, 0.0 }
 0x61b   :  { %1058 = vmatmul.mubr.f32.vlgmr.msra.gmra.mrb[4].mxu0 %v744_v38 }
 0x6ee   :  { %v832_v40 = vpop.f32.mrb[4].mxu0 }
 0x6ef   :  { %v833_v41 = vadd.f32 %v858_v39, %v832_v40  ;;  %v1059_v42 = vpop.f32.mrb[5].mxu0 }
 0x6f1   :  { %836 = vst [vmem:[%s1314_s3] sm:$0x3] %v833_v41 }
 0x6f2   :  { %841 = vsyncpa [#allocation3], 1 }

</bundles_post_ra>
